<compile_context>
chip_gen: v5e
topology: v5e:2x2
jax: 0.10.0
libtpu: 0.0.40
codegen_flags: <defaults>
</compile_context>

<pallas_src>
import jax
import jax.numpy as jnp
import numpy as np
from jax.experimental import pallas as pl
from jax.experimental.pallas import tpu as pltpu

C0_OUT, C1_OUT = 5, 8
H_IN = W_IN = 8          # input spatial -> conv0 6x6 -> conv1 4x4 -> flat 128
H0 = W0 = 6
H1 = W1 = 4
N_IN = H_IN * W_IN       # 64   flattened input pixels
N_H0 = C0_OUT * H0 * W0  # 180  flattened conv0 activations
FLAT = C1_OUT * H1 * W1  # 128  flattened conv1 activations
D_OUT = 64


def convnet_kernel(x_ref, a0_ref, b0_ref, a1_ref, b1_ref, wdt_ref, bd_ref, out_ref):
    # x_ref: (tn, 64) batch-on-sublanes block; all matmuls land on the MXU.
    h0 = jnp.dot(x_ref[...], a0_ref[...], preferred_element_type=jnp.float32)
    h0 = jnp.maximum(h0 + b0_ref[...], 0.0)                # (tn, 180)  conv0 + ReLU
    h1 = jnp.dot(h0, a1_ref[...], preferred_element_type=jnp.float32)
    h1 = jnp.maximum(h1 + b1_ref[...], 0.0)                # (tn, 128)  conv1 + ReLU
    out = jnp.dot(h1, wdt_ref[...], preferred_element_type=jnp.float32)
    out_ref[...] = out + bd_ref[...]                       # (tn, 64)   dense0


def _unrolled_conv_matrices(w0, b0, w1, b1):
    """Build dense matrices so both valid 3x3 convs become MXU matmuls."""
    # conv0: x_flat (64,) -> h0_flat (180,), h0 index = oc*36 + i*6 + j.
    oc0, i0, j0, di0, dj0 = np.indices((C0_OUT, H0, W0, 3, 3)).reshape(5, -1)
    rows0 = (i0 + di0) * W_IN + (j0 + dj0)
    cols0 = oc0 * (H0 * W0) + i0 * W0 + j0
    a0 = jnp.zeros((N_IN, N_H0), jnp.float32).at[rows0, cols0].set(
        w0[oc0, 0, di0, dj0].astype(jnp.float32))
    b0v = jnp.repeat(b0.astype(jnp.float32), H0 * W0).reshape(1, N_H0)

    # conv1: h0_flat (180,) -> h1_flat (128,), h1 index = oc*16 + i*4 + j
    # (matches torch's .view(-1, 8*4*4) C-order flatten of (N, 8, 4, 4)).
    oc1, ic1, i1, j1, di1, dj1 = np.indices(
        (C1_OUT, C0_OUT, H1, W1, 3, 3)).reshape(6, -1)
    rows1 = ic1 * (H0 * W0) + (i1 + di1) * W0 + (j1 + dj1)
    cols1 = oc1 * (H1 * W1) + i1 * W1 + j1
    a1 = jnp.zeros((N_H0, FLAT), jnp.float32).at[rows1, cols1].set(
        w1[oc1, ic1, di1, dj1].astype(jnp.float32))
    b1v = jnp.repeat(b1.astype(jnp.float32), H1 * W1).reshape(1, FLAT)
    return a0, b0v, a1, b1v


def _round_up(v, m):
    return ((v + m - 1) // m) * m


def _pick_batch_block(n, block_n):
    blk = max(128, (int(block_n) // 128) * 128)    # lane/sublane-safe multiple of 128
    blk = min(blk, _round_up(n, 128))              # never bigger than padded N
    if n > 128:
        # ensure >= 2 grid blocks so v7x's two TensorCores both get work
        blk = min(blk, _round_up((n + 1) // 2, 128))
    n_pad = _round_up(n, blk)
    return blk, n_pad


def convnet_forward(x, params, block_n=1024):
    """x: (N, 1, 8, 8) float32 (NCHW like PyTorch). Returns (N, 64) float32."""
    w0, b0, w1, b1, wd, bd = params
    n = x.shape[0]
    blk, n_pad = _pick_batch_block(n, block_n)
    n_blocks = n_pad // blk

    # Free layout change: NCHW (N,1,8,8) -> (N,64); pad batch rows up to a
    # whole number of blocks (padded rows produce garbage, sliced off below).
    xf = x.reshape(n, N_IN).astype(jnp.float32)
    xf = jnp.pad(xf, ((0, n_pad - n), (0, 0)))

    a0, b0v, a1, b1v = _unrolled_conv_matrices(w0, b0, w1, b1)
    wdt = wd.astype(jnp.float32).T                 # (128, 64): out = h1 @ wd.T
    bdv = bd.astype(jnp.float32).reshape(1, D_OUT)

    out = pl.pallas_call(
        convnet_kernel,
        out_shape=jax.ShapeDtypeStruct((n_pad, D_OUT), jnp.float32),
        grid_spec=pltpu.PrefetchScalarGridSpec(
            num_scalar_prefetch=0,
            grid=(n_blocks,),
            in_specs=[
                pl.BlockSpec((blk, N_IN), lambda i: (i, 0)),    # x block (pipelined)
                pl.BlockSpec((N_IN, N_H0), lambda i: (0, 0)),   # A0 (resident)
                pl.BlockSpec((1, N_H0), lambda i: (0, 0)),      # b0
                pl.BlockSpec((N_H0, FLAT), lambda i: (0, 0)),   # A1 (resident)
                pl.BlockSpec((1, FLAT), lambda i: (0, 0)),      # b1
                pl.BlockSpec((FLAT, D_OUT), lambda i: (0, 0)),  # wd.T (resident)
                pl.BlockSpec((1, D_OUT), lambda i: (0, 0)),     # bd
            ],
            out_specs=pl.BlockSpec((blk, D_OUT), lambda i: (i, 0)),
        ),
        compiler_params=pltpu.CompilerParams(
            dimension_semantics=("parallel",),     # shard batch blocks across TCs (v7x)
        ),
    )(xf, a0, b0v, a1, b1v, wdt, bdv)

    return out[:n]                                  # (N, 64)


def ref_forward(x, params):
    """Pure-JAX reference replicating the PyTorch forward."""
    w0, b0, w1, b1, wd, bd = params
    dn = ("NCHW", "OIHW", "NCHW")
    h = jax.lax.conv_general_dilated(x, w0, (1, 1), "VALID", dimension_numbers=dn)
    h = jnp.maximum(h + b0[None, :, None, None], 0.0)
    h = jax.lax.conv_general_dilated(h, w1, (1, 1), "VALID", dimension_numbers=dn)
    h = jnp.maximum(h + b1[None, :, None, None], 0.0)
    h = h.reshape(h.shape[0], -1)                   # (N, 128), C-order == torch .view
    return h @ wd.T + bd


if __name__ == "__main__":
    key = jax.random.PRNGKey(0)
    k = jax.random.split(key, 8)

    # Deterministic synthetic parameters (shapes from ConvNetOneSide.__init__)
    w0 = 0.2 * jax.random.normal(k[1], (C0_OUT, 1, 3, 3), dtype=jnp.float32)
    b0 = 0.1 * jax.random.normal(k[2], (C0_OUT,), dtype=jnp.float32)
    w1 = 0.2 * jax.random.normal(k[3], (C1_OUT, C0_OUT, 3, 3), dtype=jnp.float32)
    b1 = 0.1 * jax.random.normal(k[4], (C1_OUT,), dtype=jnp.float32)
    wd = 0.1 * jax.random.normal(k[5], (D_OUT, FLAT), dtype=jnp.float32)
    bd = 0.1 * jax.random.normal(k[6], (D_OUT,), dtype=jnp.float32)
    params = (w0, b0, w1, b1, wd, bd)

    # Small single-block case (batch=2, 1x8x8 input as the module implies).
    N = 2
    x = jax.random.normal(k[0], (N, 1, H_IN, W_IN), dtype=jnp.float32)
    out = jax.block_until_ready(convnet_forward(x, params))
    ref = jax.block_until_ready(ref_forward(x, params))
    assert out.shape == (N, D_OUT)
    np.testing.assert_allclose(np.asarray(out), np.asarray(ref), rtol=1e-4, atol=1e-4)

    # Multi-block case exercising the batch grid, pipelining and padding.
    N2 = 300
    x2 = jax.random.normal(k[7], (N2, 1, H_IN, W_IN), dtype=jnp.float32)
    out2 = jax.block_until_ready(convnet_forward(x2, params, block_n=1024))
    ref2 = jax.block_until_ready(ref_forward(x2, params))
    assert out2.shape == (N2, D_OUT)
    np.testing.assert_allclose(np.asarray(out2), np.asarray(ref2), rtol=1e-4, atol=1e-4)

    print("KERNEL_OK")
</pallas_src>

<mosaic_0001>
module attributes {stable_mosaic.version = 11 : i64} {
  func.func @convnet_kernel(%arg0: i32, %arg1: memref<128x64xf32, #tpu.memory_space<vmem>>, %arg2: memref<64x180xf32, #tpu.memory_space<vmem>>, %arg3: memref<1x180xf32, #tpu.memory_space<vmem>>, %arg4: memref<180x128xf32, #tpu.memory_space<vmem>>, %arg5: memref<1x128xf32, #tpu.memory_space<vmem>>, %arg6: memref<128x64xf32, #tpu.memory_space<vmem>>, %arg7: memref<1x64xf32, #tpu.memory_space<vmem>>, %arg8: memref<128x64xf32, #tpu.memory_space<vmem>>) attributes {dimension_semantics = [#tpu.dimension_semantics<parallel>], iteration_bounds = array<i64: 1>, scalar_prefetch = 0 : i64, scratch_operands = 0 : i64, tpu.core_type = #tpu.core_type<tc>, window_params = [{transform_indices = @transform_0, window_bounds = array<i64: 128, 64>}, {pipeline_mode = #tpu.pipeline_mode<synchronous>, transform_indices = @transform_1, window_bounds = array<i64: 64, 180>}, {pipeline_mode = #tpu.pipeline_mode<synchronous>, transform_indices = @transform_2, window_bounds = array<i64: 1, 180>}, {pipeline_mode = #tpu.pipeline_mode<synchronous>, transform_indices = @transform_3, window_bounds = array<i64: 180, 128>}, {pipeline_mode = #tpu.pipeline_mode<synchronous>, transform_indices = @transform_4, window_bounds = array<i64: 1, 128>}, {pipeline_mode = #tpu.pipeline_mode<synchronous>, transform_indices = @transform_5, window_bounds = array<i64: 128, 64>}, {pipeline_mode = #tpu.pipeline_mode<synchronous>, transform_indices = @transform_6, window_bounds = array<i64: 1, 64>}, {transform_indices = @transform_7, window_bounds = array<i64: 128, 64>}]} {
    %c0 = arith.constant 0 : index
    %c0_0 = arith.constant 0 : index
    %0 = vector.load %arg1[%c0, %c0_0] : memref<128x64xf32, #tpu.memory_space<vmem>>, vector<128x64xf32>
    %c0_1 = arith.constant 0 : index
    %c0_2 = arith.constant 0 : index
    %1 = vector.load %arg2[%c0_1, %c0_2] : memref<64x180xf32, #tpu.memory_space<vmem>>, vector<64x180xf32>
    %cst = arith.constant dense<0.000000e+00> : vector<128x180xf32>
    %2 = tpu.matmul %0, %1, %cst {dimension_numbers = #tpu.dot_dimension_numbers<[1], [0], [0], [1], [0, 0, 1, 1], [], []>} : vector<128x64xf32>, vector<64x180xf32>, vector<128x180xf32> -> vector<128x180xf32>
    %c0_3 = arith.constant 0 : index
    %c0_4 = arith.constant 0 : index
    %3 = vector.load %arg3[%c0_3, %c0_4] : memref<1x180xf32, #tpu.memory_space<vmem>>, vector<1x180xf32>
    %4 = vector.broadcast %3 : vector<1x180xf32> to vector<128x180xf32>
    %5 = arith.addf %2, %4 : vector<128x180xf32>
    %cst_5 = arith.constant 0.000000e+00 : f32
    %6 = vector.broadcast %cst_5 : f32 to vector<128x180xf32>
    %7 = arith.maximumf %5, %6 : vector<128x180xf32>
    %c0_6 = arith.constant 0 : index
    %c0_7 = arith.constant 0 : index
    %8 = vector.load %arg4[%c0_6, %c0_7] : memref<180x128xf32, #tpu.memory_space<vmem>>, vector<180x128xf32>
    %cst_8 = arith.constant dense<0.000000e+00> : vector<128x128xf32>
    %9 = tpu.matmul %7, %8, %cst_8 {dimension_numbers = #tpu.dot_dimension_numbers<[1], [0], [0], [1], [0, 0, 1, 1], [], []>} : vector<128x180xf32>, vector<180x128xf32>, vector<128x128xf32> -> vector<128x128xf32>
    %c0_9 = arith.constant 0 : index
    %c0_10 = arith.constant 0 : index
    %10 = vector.load %arg5[%c0_9, %c0_10] : memref<1x128xf32, #tpu.memory_space<vmem>>, vector<1x128xf32>
    %11 = vector.broadcast %10 : vector<1x128xf32> to vector<128x128xf32>
    %12 = arith.addf %9, %11 : vector<128x128xf32>
    %cst_11 = arith.constant 0.000000e+00 : f32
    %13 = vector.broadcast %cst_11 : f32 to vector<128x128xf32>
    %14 = arith.maximumf %12, %13 : vector<128x128xf32>
    %c0_12 = arith.constant 0 : index
    %c0_13 = arith.constant 0 : index
    %15 = vector.load %arg6[%c0_12, %c0_13] : memref<128x64xf32, #tpu.memory_space<vmem>>, vector<128x64xf32>
    %cst_14 = arith.constant dense<0.000000e+00> : vector<128x64xf32>
    %16 = tpu.matmul %14, %15, %cst_14 {dimension_numbers = #tpu.dot_dimension_numbers<[1], [0], [0], [1], [0, 0, 1, 1], [], []>} : vector<128x128xf32>, vector<128x64xf32>, vector<128x64xf32> -> vector<128x64xf32>
    %c0_15 = arith.constant 0 : index
    %c0_16 = arith.constant 0 : index
    %17 = vector.load %arg7[%c0_15, %c0_16] : memref<1x64xf32, #tpu.memory_space<vmem>>, vector<1x64xf32>
    %18 = vector.broadcast %17 : vector<1x64xf32> to vector<128x64xf32>
    %19 = arith.addf %16, %18 : vector<128x64xf32>
    %c0_17 = arith.constant 0 : index
    %c0_18 = arith.constant 0 : index
    %20 = vector.load %arg8[%c0_17, %c0_18] : memref<128x64xf32, #tpu.memory_space<vmem>>, vector<128x64xf32>
    tpu.vector_store %arg8[%c0_17, %c0_18], %19 {strides = array<i32>} : memref<128x64xf32, #tpu.memory_space<vmem>>, vector<128x64xf32>,
    return
  }
  func.func @transform_0(%arg0: i32) -> (i32, i32) {
    %c0_i32 = arith.constant 0 : i32
    %c0_i32_0 = arith.constant 0 : i32
    return %arg0, %c0_i32 : i32, i32
  }
  func.func @transform_1(%arg0: i32) -> (i32, i32) {
    %c0_i32 = arith.constant 0 : i32
    %c0_i32_0 = arith.constant 0 : i32
    %c0_i32_1 = arith.constant 0 : i32
    return %c0_i32, %c0_i32_0 : i32, i32
  }
  func.func @transform_2(%arg0: i32) -> (i32, i32) {
    %c0_i32 = arith.constant 0 : i32
    %c0_i32_0 = arith.constant 0 : i32
    %c0_i32_1 = arith.constant 0 : i32
    return %c0_i32, %c0_i32_0 : i32, i32
  }
  func.func @transform_3(%arg0: i32) -> (i32, i32) {
    %c0_i32 = arith.constant 0 : i32
    %c0_i32_0 = arith.constant 0 : i32
    %c0_i32_1 = arith.constant 0 : i32
    return %c0_i32, %c0_i32_0 : i32, i32
  }
  func.func @transform_4(%arg0: i32) -> (i32, i32) {
    %c0_i32 = arith.constant 0 : i32
    %c0_i32_0 = arith.constant 0 : i32
    %c0_i32_1 = arith.constant 0 : i32
    return %c0_i32, %c0_i32_0 : i32, i32
  }
  func.func @transform_5(%arg0: i32) -> (i32, i32) {
    %c0_i32 = arith.constant 0 : i32
    %c0_i32_0 = arith.constant 0 : i32
    %c0_i32_1 = arith.constant 0 : i32
    return %c0_i32, %c0_i32_0 : i32, i32
  }
  func.func @transform_6(%arg0: i32) -> (i32, i32) {
    %c0_i32 = arith.constant 0 : i32
    %c0_i32_0 = arith.constant 0 : i32
    %c0_i32_1 = arith.constant 0 : i32
    return %c0_i32, %c0_i32_0 : i32, i32
  }
  func.func @transform_7(%arg0: i32) -> (i32, i32) {
    %c0_i32 = arith.constant 0 : i32
    %c0_i32_0 = arith.constant 0 : i32
    return %arg0, %c0_i32 : i32, i32
  }
}

</mosaic_0001>

<bundles_post_ra>
// kernel: tpu_custom_call.1
= control target key start
LH: loop header
LB: loop body
LE: loop exit
PB: predicated region body
PF: predicated region fallthrough
CT: control target
= control target key end

     0   :  { %vm64_vm0 = vcmask 523264   ;;  %vm351_vm1 = vcmask 1043456   ;;  %vm302_vm2 = vcmask 424960   ;;  %s1129_s1 = inlined_call_operand.vmem [shape: f32[64,180], index: 1, kind: input, shape index: {}]   ;;  %s1130_s0 = inlined_call_operand.vmem [shape: f32[128,64], index: 0, kind: input, shape index: {}]   ;;  %s1131_s3 = inlined_call_operand.vmem [shape: f32[180,128], index: 3, kind: input, shape index: {}]   ;;  %s1132_s2 = inlined_call_operand.vmem [shape: f32[1,180], index: 2, kind: input, shape index: {}]   ;;  %s1133_s4 = inlined_call_operand.vmem [shape: f32[1,128], index: 4, kind: input, shape index: {}]   ;;  %s1134_s5 = inlined_call_operand.vmem [shape: f32[128,64], index: 5, kind: input, shape index: {}]   ;;  %s1135_s6 = inlined_call_operand.vmem [shape: f32[1,64], index: 6, kind: input, shape index: {}]   ;;  %s1136_s7 = inlined_call_operand.vmem [shape: f32[128,64], index: 7, kind: output, shape index: {}]  }
   0x1   :  { %v56_v0 = vld [vmem:[%s1129_s1 + $0x70] sm:$0xff]  ;;  %v54_v1 = vld [vmem:[%s1129_s1 + $0x60] sm:$0xff]  ;;  %v57_v10 = vld [vmem:[%s1129_s1 + $0x78] sm:$0xff] }
   0x2   :  { %121 = vmatpush.msra.mxu0 %v56_v0  ;;  %655 = vmatpush.msra.mxu1 %v56_v0  ;;  %v52_v2 = vld [vmem:[%s1129_s1 + $0x50] sm:$0xff]  ;;  %v50_v3 = vld [vmem:[%s1129_s1 + $0x40] sm:$0xff]  ;;  %v55_v11 = vld [vmem:[%s1129_s1 + $0x68] sm:$0xff] }
   0x3   :  { %656 = vmatpush.msra.mxu2 %v56_v0  ;;  %v48_v4 = vld [vmem:[%s1129_s1 + $0x30] sm:$0xff]  ;;  %v46_v5 = vld [vmem:[%s1129_s1 + $0x20] sm:$0xff]  ;;  %v53_v12 = vld [vmem:[%s1129_s1 + $0x58] sm:$0xff] }
   0x4   :  { %122 = vmatpush.msra.mxu0 %v54_v1  ;;  %657 = vmatpush.msra.mxu1 %v54_v1  ;;  %v44_v6 = vld [vmem:[%s1129_s1 + $0x10] sm:$0xff]  ;;  %v42_v7 = vld [vmem:[%s1129_s1] sm:$0xff]  ;;  %v51_v13 = vld [vmem:[%s1129_s1 + $0x48] sm:$0xff] }
   0x5   :  { %658 = vmatpush.msra.mxu2 %v54_v1  ;;  %v26_v8 = vld [vmem:[%s1130_s0] sm:$0xff]  ;;  %v757_v9 = vld [vmem:[%s1130_s0 + $0x50] sm:$0xff]  ;;  %v27_v14 = vld [vmem:[%s1130_s0 + $0x8] sm:$0xff] }
   0x6   :  { %123 = vmatpush.msra.mxu0 %v52_v2  ;;  %659 = vmatpush.msra.mxu1 %v52_v2  ;;  %v780_v15 = vld [vmem:[%s1130_s0 + $0x58] sm:$0xff]  ;;  %v47_v17 = vld [vmem:[%s1129_s1 + $0x28] sm:$0xff]  ;;  %v28_v20 = vld [vmem:[%s1130_s0 + $0x10] sm:$0xff] }
   0x7   :  { %660 = vmatpush.msra.mxu2 %v52_v2  ;;  %v49_v16 = vld [vmem:[%s1129_s1 + $0x38] sm:$0xff]  ;;  %v43_v19 = vld [vmem:[%s1129_s1 + $0x8] sm:$0xff]  ;;  %v30_v22 = vld [vmem:[%s1130_s0 + $0x20] sm:$0xff] }
   0x8   :  { %124 = vmatpush.msra.mxu0 %v50_v3  ;;  %661 = vmatpush.msra.mxu1 %v50_v3  ;;  %v45_v18 = vld [vmem:[%s1129_s1 + $0x18] sm:$0xff]  ;;  %v31_v23 = vld [vmem:[%s1130_s0 + $0x28] sm:$0xff]  ;;  %v297_v24 = vld [vmem:[%s1131_s3 + $0xb0] sm:$0xf] }
   0x9   :  { %662 = vmatpush.msra.mxu2 %v50_v3  ;;  %v29_v21 = vld [vmem:[%s1130_s0 + $0x18] sm:$0xff]  ;;  %672 = vmatpush.msk.msra.mxu3 %vm351_vm1, %v297_v24  ;;  %v32_v25 = vld [vmem:[%s1130_s0 + $0x30] sm:$0xff]  ;;  %v296_v26 = vld [vmem:[%s1131_s3 + $0xa8] sm:$0xff] }
   0xa   :  { %125 = vmatpush.msra.mxu0 %v48_v4  ;;  %663 = vmatpush.msra.mxu1 %v48_v4  ;;  %v33_v27 = vld [vmem:[%s1130_s0 + $0x38] sm:$0xff]  ;;  %v295_v28 = vld [vmem:[%s1131_s3 + $0xa0] sm:$0xff]  ;;  %v289_v32 = vld [vmem:[%s1131_s3 + $0x70] sm:$0xff] }
   0xb   :  { %664 = vmatpush.msra.mxu2 %v48_v4  ;;  %674 = vmatpush.msra.mxu3 %v296_v26  ;;  %v34_v29 = vld [vmem:[%s1130_s0 + $0x40] sm:$0xff]  ;;  %v290_v31 = vld [vmem:[%s1131_s3 + $0x78] sm:$0xff]  ;;  %v288_v33 = vld [vmem:[%s1131_s3 + $0x68] sm:$0xff] }
   0xc   :  { %126 = vmatpush.msra.mxu0 %v46_v5  ;;  %665 = vmatpush.msra.mxu1 %v46_v5  ;;  %v38_v30 = vld [vmem:[%s1130_s0 + $0x60] sm:$0xff]  ;;  %v35_v34 = vld [vmem:[%s1130_s0 + $0x48] sm:$0xff]  ;;  %v286_v37 = vld [vmem:[%s1131_s3 + $0x58] sm:$0xff] }
   0xd   :  { %666 = vmatpush.msra.mxu2 %v46_v5  ;;  %676 = vmatpush.msra.mxu3 %v295_v28  ;;  %v287_v35 = vld [vmem:[%s1131_s3 + $0x60] sm:$0xff]  ;;  %v39_v36 = vld [vmem:[%s1130_s0 + $0x68] sm:$0xff]  ;;  %v294_v38 = vld [vmem:[%s1131_s3 + $0x98] sm:$0xff] }
   0xe   :  { %127 = vmatpush.msra.mxu0 %v44_v6  ;;  %667 = vmatpush.msra.mxu1 %v44_v6  ;;  %v285_v39 = vld [vmem:[%s1131_s3 + $0x50] sm:$0xff]  ;;  %v284_v40 = vld [vmem:[%s1131_s3 + $0x48] sm:$0xff]  ;;  %v283_v41 = vld [vmem:[%s1131_s3 + $0x40] sm:$0xff] }
   0xf   :  { %668 = vmatpush.msra.mxu2 %v44_v6  ;;  %678 = vmatpush.msra.mxu3 %v294_v38  ;;  %v40_v42 = vld [vmem:[%s1130_s0 + $0x70] sm:$0xff]  ;;  %v282_v43 = vld [vmem:[%s1131_s3 + $0x38] sm:$0xff]  ;;  %v280_v46 = vld [vmem:[%s1131_s3 + $0x28] sm:$0xff] }
  0x10   :  { %128 = vmatpush.msra.mxu0 %v42_v7  ;;  %669 = vmatpush.msra.mxu1 %v42_v7  ;;  %v293_v44 = vld [vmem:[%s1131_s3 + $0x90] sm:$0xff]  ;;  %v279_v47 = vld [vmem:[%s1131_s3 + $0x20] sm:$0xff]  ;;  %v41_v48 = vld [vmem:[%s1130_s0 + $0x78] sm:$0xff] }
  0x11   :  { %606 = vmatmul.msk.f32.vlgmr.msra.gmra.mxu0 %vm64_vm0, %v26_v8  ;;  %616 = vmatmul.msk.f32.vlgmr.msra.gmra.mxu1 %vm64_vm0, %v757_v9  ;;  %v281_v45 = vld [vmem:[%s1131_s3 + $0x30] sm:$0xff]  ;;  %v278_v49 = vld [vmem:[%s1131_s3 + $0x18] sm:$0xff]  ;;  %v276_v51 = vld [vmem:[%s1131_s3 + $0x8] sm:$0xff] }
  0x12   :  { %186 = vmatpush.msrb.mxu1 %v57_v10  ;;  %670 = vmatpush.msra.mxu2 %v42_v7  ;;  %v277_v50 = vld [vmem:[%s1131_s3 + $0x10] sm:$0xff]  ;;  %v275_v52 = vld [vmem:[%s1131_s3] sm:$0xff]  ;;  %v292_v53 = vld [vmem:[%s1131_s3 + $0x88] sm:$0xff] }
  0x13   :  { %638 = vmatpush.msk.msrb.mxu0 %vm351_vm1, %v297_v24  ;;  %618 = vmatmul.msk.f32.vlgmr.msra.gmra.mxu2 %vm64_vm0, %v38_v30  ;;  %v291_v54 = vld [vmem:[%s1131_s3 + $0x80] sm:$0xff] }
  0x14   :  { %187 = vmatpush.msrb.mxu1 %v55_v11  ;;  %355 = vmatpush.msrb.mxu2 %v290_v31  ;;  %v58_v55 = vld [vmem:[%s1132_s2] sm:$0x3] }
  0x15   :  { %430 = vmatpush.msrb.mxu0 %v296_v26  ;;  %680 = vmatpush.msra.mxu3 %v293_v44  ;;  %v933_v56 = vperm.slane %v58_v55, 0  ;;  %v943_v1 = vperm.slane %v58_v55, 1 }
  0x16   :  { %188 = vmatpush.msrb.mxu1 %v53_v12  ;;  %356 = vmatpush.msrb.mxu2 %v289_v32 }
  0x17   :  { %431 = vmatpush.msrb.mxu0 %v295_v28  ;;  %682 = vmatpush.msra.mxu3 %v292_v53 }
  0x18   :  { %189 = vmatpush.msrb.mxu1 %v51_v13  ;;  %357 = vmatpush.msrb.mxu2 %v288_v33 }
  0x19   :  { %607 = vmatmul.msk.f32.gmra.mxu0 %vm64_vm0, %v27_v14  ;;  %617 = vmatmul.msk.f32.gmra.mxu1 %vm64_vm0, %v780_v15 }
  0x1a   :  { %190 = vmatpush.msrb.mxu1 %v49_v16  ;;  %358 = vmatpush.msrb.mxu2 %v287_v35 }
  0x1b   :  { %619 = vmatmul.msk.f32.gmra.mxu2 %vm64_vm0, %v39_v36  ;;  %432 = vmatpush.msrb.mxu0 %v294_v38 }
  0x1c   :  { %191 = vmatpush.msrb.mxu1 %v47_v17  ;;  %359 = vmatpush.msrb.mxu2 %v286_v37 }
  0x1d   :  { %433 = vmatpush.msrb.mxu0 %v293_v44  ;;  %684 = vmatpush.msra.mxu3 %v291_v54 }
  0x1e   :  { %192 = vmatpush.msrb.mxu1 %v45_v18  ;;  %360 = vmatpush.msrb.mxu2 %v285_v39 }
  0x1f   :  { %434 = vmatpush.msrb.mxu0 %v292_v53 }
  0x20   :  { %193 = vmatpush.msrb.mxu1 %v43_v19  ;;  %361 = vmatpush.msrb.mxu2 %v284_v40 }
  0x21   :  { %608 = vmatmul.msk.f32.gmra.mxu0 %vm64_vm0, %v28_v20  ;;  %622 = vmatmul.msk.f32.vlgmr.msrb.gmra.mxu1 %vm64_vm0, %v26_v8 }
  0x22   :  { %671 = vmatpush.msk.msra.mxu1 %vm351_vm1, %v297_v24  ;;  %362 = vmatpush.msrb.mxu2 %v283_v41 }
  0x23   :  { %620 = vmatmul.msk.f32.gmra.mxu2 %vm64_vm0, %v40_v42  ;;  %435 = vmatpush.msrb.mxu0 %v291_v54 }
  0x24   :  { %673 = vmatpush.msra.mxu1 %v296_v26  ;;  %363 = vmatpush.msrb.mxu2 %v282_v43 }
  0x26   :  { %675 = vmatpush.msra.mxu1 %v295_v28  ;;  %364 = vmatpush.msrb.mxu2 %v281_v45 }
  0x28   :  { %677 = vmatpush.msra.mxu1 %v294_v38  ;;  %365 = vmatpush.msrb.mxu2 %v280_v46 }
  0x29   :  { %609 = vmatmul.msk.f32.gmra.mxu0 %vm64_vm0, %v29_v21  ;;  %623 = vmatmul.msk.f32.gmra.mxu1 %vm64_vm0, %v27_v14 }
  0x2a   :  { %679 = vmatpush.msra.mxu1 %v293_v44  ;;  %366 = vmatpush.msrb.mxu2 %v279_v47 }
  0x2b   :  { %621 = vmatmul.msk.f32.gmra.mxu2 %vm64_vm0, %v41_v48 }
  0x2c   :  { %367 = vmatpush.msrb.mxu2 %v278_v49  ;;  %681 = vmatpush.msra.mxu1 %v292_v53 }
  0x2e   :  { %368 = vmatpush.msrb.mxu2 %v277_v50  ;;  %683 = vmatpush.msra.mxu1 %v291_v54 }
  0x30   :  { %369 = vmatpush.msrb.mxu2 %v276_v51 }
  0x31   :  { %610 = vmatmul.msk.f32.gmra.mxu0 %vm64_vm0, %v30_v22  ;;  %624 = vmatmul.msk.f32.gmra.mxu1 %vm64_vm0, %v28_v20 }
  0x32   :  { %370 = vmatpush.msrb.mxu2 %v275_v52 }
  0x39   :  { %611 = vmatmul.msk.f32.gmra.mxu0 %vm64_vm0, %v31_v23  ;;  %625 = vmatmul.msk.f32.gmra.mxu1 %vm64_vm0, %v29_v21 }
  0x41   :  { %612 = vmatmul.msk.f32.gmra.mxu0 %vm64_vm0, %v32_v25  ;;  %626 = vmatmul.msk.f32.gmra.mxu1 %vm64_vm0, %v30_v22 }
  0x49   :  { %613 = vmatmul.msk.f32.gmra.mxu0 %vm64_vm0, %v33_v27  ;;  %627 = vmatmul.msk.f32.gmra.mxu1 %vm64_vm0, %v31_v23 }
  0x51   :  { %614 = vmatmul.msk.f32.gmra.mxu0 %vm64_vm0, %v34_v29  ;;  %628 = vmatmul.msk.f32.gmra.mxu1 %vm64_vm0, %v32_v25 }
  0x59   :  { %615 = vmatmul.msk.f32.gmra.mxu0 %vm64_vm0, %v35_v34  ;;  %629 = vmatmul.msk.f32.gmra.mxu1 %vm64_vm0, %v33_v27 }
  0x61   :  { %630 = vmatmul.msk.f32.gmra.mxu1 %vm64_vm0, %v34_v29 }
  0x69   :  { %631 = vmatmul.msk.f32.gmra.mxu1 %vm64_vm0, %v35_v34 }
  0x71   :  { %632 = vmatmul.msk.f32.gmra.mxu1 %vm64_vm0, %v757_v9 }
  0x79   :  { %633 = vmatmul.msk.f32.gmra.mxu1 %vm64_vm0, %v780_v15 }
  0x81   :  { %634 = vmatmul.msk.f32.gmra.mxu1 %vm64_vm0, %v38_v30 }
  0x89   :  { %635 = vmatmul.msk.f32.gmra.mxu1 %vm64_vm0, %v39_v36 }
  0x8e   :  { %v130_v57 = vpop.f32.mrf.mxu0  ;;  %v935_v58 = vpop.f32.mrf.mxu1 }
  0x8f   :  { %v131_v59 = vadd.f32 %v130_v57, %v933_v56  ;;  %v161_v50 = vadd.f32 %v935_v58, %v933_v56 }
  0x91   :  { %v243_v60 = vmax.f32 %v131_v59, 0.0  ;;  %636 = vmatmul.msk.f32.gmra.mxu1 %vm64_vm0, %v40_v42  ;;  %v263_v53 = vmax.f32 %v161_v50, 0.0  ;;  %v516_v59 = vld [vmem:[%s1134_s5 + $0x78] sm:$0xff] }
  0x92   :  { %521 = vmatpush.msrb.mxu3 %v516_v59 }
  0x93   :  { %371 = vmatmul.f32.vlgmr.msrb.gmra.mxu2 %v243_v60 }
  0x96   :  { %v133_v61 = vpop.f32.mrf.mxu0  ;;  %v939_v62 = vpop.f32.mrf.mxu1 }
  0x97   :  { %v134_v63 = vadd.f32 %v133_v61, %v933_v56  ;;  %v166_v55 = vpop.f32.mrf.mxu2  ;;  %v164_v57 = vadd.f32 %v939_v62, %v933_v56  ;;  %v515_v61 = vld [vmem:[%s1134_s5 + $0x70] sm:$0xff] }
  0x98   :  { %522 = vmatpush.msrb.mxu3 %v515_v61  ;;  %v167_v62 = vadd.f32 %v166_v55, %v933_v56 }
  0x99   :  { %v245_v0 = vmax.f32 %v134_v63, 0.0  ;;  %637 = vmatmul.msk.f32.gmra.mxu1 %vm64_vm0, %v41_v48  ;;  %v265_v63 = vmax.f32 %v164_v57, 0.0 }
  0x9b   :  { %374 = vmatmul.f32.gmra.mxu2 %v245_v0 }
  0x9e   :  { %v136_v2 = vpop.f32.mrf.mxu0  ;;  %v195_v3 = vpop.f32.mrf.mxu1 }
  0x9f   :  { %v137_v4 = vadd.f32 %v136_v2, %v933_v56  ;;  %v196_v5 = vadd.f32 %v195_v3, %v943_v1  ;;  %v514_v2 = vld [vmem:[%s1134_s5 + $0x68] sm:$0xff]  ;;  %v513_v3 = vld [vmem:[%s1134_s5 + $0x60] sm:$0xff] }
  0xa0   :  { %523 = vmatpush.msrb.mxu3 %v514_v2 }
  0xa1   :  { %v247_v6 = vmax.f32 %v137_v4, 0.0  ;;  %v244_v7 = vmax.f32 %v196_v5, 0.0  ;;  %v512_v4 = vld [vmem:[%s1134_s5 + $0x58] sm:$0xff] }
  0xa2   :  { %524 = vmatpush.msrb.mxu3 %v513_v3 }
  0xa3   :  { %377 = vmatmul.f32.gmra.mxu2 %v247_v6  ;;  %639 = vmatmul.msk.f32.vlgmr.msrb.gmra.mxu0 %vm302_vm2, %v244_v7  ;;  %v169_v6 = vpop.f32.mrf.mxu2 }
  0xa4   :  { %525 = vmatpush.msrb.mxu3 %v512_v4 }
  0xa6   :  { %v139_v8 = vpop.f32.mrf.mxu0  ;;  %v198_v9 = vpop.f32.mrf.mxu1 }
  0xa7   :  { %v140_v10 = vadd.f32 %v139_v8, %v933_v56  ;;  %v199_v11 = vadd.f32 %v198_v9, %v943_v1  ;;  %v267_v8 = vmax.f32 %v167_v62, 0.0  ;;  %v511_v9 = vld [vmem:[%s1134_s5 + $0x50] sm:$0xff] }
  0xa8   :  { %526 = vmatpush.msrb.mxu3 %v511_v9 }
  0xa9   :  { %v249_v12 = vmax.f32 %v140_v10, 0.0  ;;  %v246_v13 = vmax.f32 %v199_v11, 0.0  ;;  %v510_v11 = vld [vmem:[%s1134_s5 + $0x48] sm:$0xff] }
  0xaa   :  { %527 = vmatpush.msrb.mxu3 %v510_v11 }
  0xab   :  { %380 = vmatmul.f32.gmra.mxu2 %v249_v12  ;;  %640 = vmatmul.msk.f32.gmra.mxu0 %vm302_vm2, %v246_v13  ;;  %v170_v12 = vadd.f32 %v169_v6, %v933_v56  ;;  %v509_v13 = vld [vmem:[%s1134_s5 + $0x40] sm:$0xff] }
  0xac   :  { %528 = vmatpush.msrb.mxu3 %v509_v13 }
  0xae   :  { %v142_v14 = vpop.f32.mrf.mxu0  ;;  %v201_v15 = vpop.f32.mrf.mxu1 }
  0xaf   :  { %v143_v16 = vadd.f32 %v142_v14, %v933_v56  ;;  %v202_v17 = vadd.f32 %v201_v15, %v943_v1  ;;  %v508_v14 = vld [vmem:[%s1134_s5 + $0x38] sm:$0xff] }
  0xb0   :  { %529 = vmatpush.msrb.mxu3 %v508_v14 }
  0xb1   :  { %v251_v18 = vmax.f32 %v143_v16, 0.0  ;;  %v248_v19 = vmax.f32 %v202_v17, 0.0  ;;  %v269_v17 = vmax.f32 %v170_v12, 0.0 }
  0xb3   :  { %383 = vmatmul.f32.gmra.mxu2 %v251_v18  ;;  %641 = vmatmul.msk.f32.gmra.mxu0 %vm302_vm2, %v248_v19  ;;  %v507_v18 = vld [vmem:[%s1134_s5 + $0x30] sm:$0xff]  ;;  %v172_v19 = vpop.f32.mrf.mxu2 }
  0xb4   :  { %530 = vmatpush.msrb.mxu3 %v507_v18 }
  0xb6   :  { %v145_v20 = vpop.f32.mrf.mxu0  ;;  %v204_v21 = vpop.f32.mrf.mxu1 }
  0xb7   :  { %v146_v22 = vadd.f32 %v145_v20, %v933_v56  ;;  %v205_v23 = vadd.f32 %v204_v21, %v943_v1  ;;  %v506_v21 = vld [vmem:[%s1134_s5 + $0x28] sm:$0xff] }
  0xb8   :  { %531 = vmatpush.msrb.mxu3 %v506_v21 }
  0xb9   :  { %v253_v24 = vmax.f32 %v146_v22, 0.0  ;;  %v250_v25 = vmax.f32 %v205_v23, 0.0  ;;  %v173_v22 = vadd.f32 %v172_v19, %v933_v56  ;;  %v505_v23 = vld [vmem:[%s1134_s5 + $0x20] sm:$0xff] }
  0xba   :  { %532 = vmatpush.msrb.mxu3 %v505_v23 }
  0xbb   :  { %386 = vmatmul.f32.gmra.mxu2 %v253_v24  ;;  %642 = vmatmul.msk.f32.gmra.mxu0 %vm302_vm2, %v250_v25  ;;  %v504_v24 = vld [vmem:[%s1134_s5 + $0x18] sm:$0xff] }
  0xbc   :  { %533 = vmatpush.msrb.mxu3 %v504_v24 }
  0xbe   :  { %v148_v26 = vpop.f32.mrf.mxu0  ;;  %v207_v27 = vpop.f32.mrf.mxu1 }
  0xbf   :  { %v149_v28 = vadd.f32 %v148_v26, %v933_v56  ;;  %v208_v29 = vadd.f32 %v207_v27, %v943_v1  ;;  %v271_v27 = vmax.f32 %v173_v22, 0.0 }
  0xc1   :  { %v255_v30 = vmax.f32 %v149_v28, 0.0  ;;  %v252_v31 = vmax.f32 %v208_v29, 0.0  ;;  %v503_v28 = vld [vmem:[%s1134_s5 + $0x10] sm:$0xff] }
  0xc2   :  { %534 = vmatpush.msrb.mxu3 %v503_v28 }
  0xc3   :  { %389 = vmatmul.f32.gmra.mxu2 %v255_v30  ;;  %643 = vmatmul.msk.f32.gmra.mxu0 %vm302_vm2, %v252_v31  ;;  %v502_v30 = vld [vmem:[%s1134_s5 + $0x8] sm:$0xff]  ;;  %v175_v31 = vpop.f32.mrf.mxu2 }
  0xc4   :  { %535 = vmatpush.msrb.mxu3 %v502_v30 }
  0xc6   :  { %v151_v32 = vpop.f32.mrf.mxu0  ;;  %v210_v33 = vpop.f32.mrf.mxu1 }
  0xc7   :  { %v152_v34 = vadd.f32 %v151_v32, %v933_v56  ;;  %v211_v35 = vadd.f32 %v210_v33, %v943_v1  ;;  %v176_v32 = vadd.f32 %v175_v31, %v933_v56  ;;  %v501_v33 = vld [vmem:[%s1134_s5] sm:$0xff] }
  0xc8   :  { %536 = vmatpush.msrb.mxu3 %v501_v33 }
  0xc9   :  { %v257_v36 = vmax.f32 %v152_v34, 0.0  ;;  %v254_v37 = vmax.f32 %v211_v35, 0.0 }
  0xcb   :  { %392 = vmatmul.f32.gmra.mxu2 %v257_v36  ;;  %644 = vmatmul.msk.f32.gmra.mxu0 %vm302_vm2, %v254_v37  ;;  %v273_v36 = vmax.f32 %v176_v32, 0.0 }
  0xce   :  { %v154_v38 = vpop.f32.mrf.mxu0  ;;  %v213_v39 = vpop.f32.mrf.mxu1 }
  0xcf   :  { %v155_v40 = vadd.f32 %v154_v38, %v933_v56  ;;  %v214_v41 = vadd.f32 %v213_v39, %v943_v1 }
  0xd1   :  { %v259_v42 = vmax.f32 %v155_v40, 0.0  ;;  %v256_v43 = vmax.f32 %v214_v41, 0.0 }
  0xd3   :  { %395 = vmatmul.f32.gmra.mxu2 %v259_v42  ;;  %645 = vmatmul.msk.f32.gmra.mxu0 %vm302_vm2, %v256_v43 }
  0xd6   :  { %v157_v44 = vpop.f32.mrf.mxu0  ;;  %v216_v45 = vpop.f32.mrf.mxu1 }
  0xd7   :  { %v158_v46 = vadd.f32 %v157_v44, %v933_v56  ;;  %v217_v47 = vadd.f32 %v216_v45, %v943_v1  ;;  %v1043_v44 = vld [vmem:[%s1133_s4] ss:$0 sm:$0xff] }
  0xd9   :  { %v261_v48 = vmax.f32 %v158_v46, 0.0  ;;  %v258_v49 = vmax.f32 %v217_v47, 0.0 }
  0xdb   :  { %398 = vmatmul.f32.gmra.mxu2 %v261_v48  ;;  %646 = vmatmul.msk.f32.gmra.mxu0 %vm302_vm2, %v258_v49 }
  0xde   :  { %v219_v51 = vpop.f32.mrf.mxu1 }
  0xdf   :  { %v220_v52 = vadd.f32 %v219_v51, %v943_v1 }
  0xe1   :  { %v260_v54 = vmax.f32 %v220_v52, 0.0 }
  0xe3   :  { %401 = vmatmul.f32.gmra.mxu2 %v263_v53  ;;  %647 = vmatmul.msk.f32.gmra.mxu0 %vm302_vm2, %v260_v54 }
  0xe6   :  { %v222_v60 = vpop.f32.mrf.mxu1 }
  0xe7   :  { %v223_v58 = vadd.f32 %v222_v60, %v943_v1 }
  0xe9   :  { %v262_v0 = vmax.f32 %v223_v58, 0.0 }
  0xeb   :  { %404 = vmatmul.f32.gmra.mxu2 %v265_v63  ;;  %648 = vmatmul.msk.f32.gmra.mxu0 %vm302_vm2, %v262_v0 }
  0xee   :  { %v225_v5 = vpop.f32.mrf.mxu1 }
  0xef   :  { %v226_v7 = vadd.f32 %v225_v5, %v943_v1 }
  0xf1   :  { %v264_v10 = vmax.f32 %v226_v7, 0.0 }
  0xf3   :  { %649 = vmatmul.msk.f32.vlgmr.msra.gmra.mxu1 %vm302_vm2, %v264_v10  ;;  %407 = vmatmul.f32.gmra.mxu2 %v267_v8 }
  0xf6   :  { %v228_v15 = vpop.f32.mrf.mxu1 }
  0xf7   :  { %v229_v16 = vadd.f32 %v228_v15, %v943_v1 }
  0xf9   :  { %v266_v20 = vmax.f32 %v229_v16, 0.0 }
  0xfb   :  { %650 = vmatmul.msk.f32.gmra.mxu1 %vm302_vm2, %v266_v20  ;;  %410 = vmatmul.f32.gmra.mxu2 %v269_v17 }
  0xfe   :  { %v231_v25 = vpop.f32.mrf.mxu1 }
  0xff   :  { %v232_v26 = vadd.f32 %v231_v25, %v943_v1 }
 0x101   :  { %v268_v29 = vmax.f32 %v232_v26, 0.0 }
 0x103   :  { %651 = vmatmul.msk.f32.vlgmr.msra.gmra.mxu3 %vm302_vm2, %v268_v29  ;;  %413 = vmatmul.f32.gmra.mxu2 %v271_v27 }
 0x106   :  { %v234_v34 = vpop.f32.mrf.mxu1 }
 0x107   :  { %v235_v35 = vadd.f32 %v234_v34, %v943_v1 }
 0x109   :  { %v270_v37 = vmax.f32 %v235_v35, 0.0 }
 0x10b   :  { %652 = vmatmul.msk.f32.gmra.mxu3 %vm302_vm2, %v270_v37  ;;  %416 = vmatmul.f32.gmra.mxu2 %v273_v36 }
 0x10e   :  { %v237_v38 = vpop.f32.mrf.mxu1 }
 0x10f   :  { %v238_v39 = vadd.f32 %v237_v38, %v943_v1 }
 0x111   :  { %v272_v40 = vmax.f32 %v238_v39, 0.0 }
 0x113   :  { %653 = vmatmul.msk.f32.gmra.mxu3 %vm302_vm2, %v272_v40 }
 0x116   :  { %v240_v56 = vpop.f32.mrf.mxu1  ;;  %v372_v41 = vpop.f32.mrf.mxu2 }
 0x117   :  { %v241_v42 = vadd.f32 %v240_v56, %v943_v1  ;;  %v373_v45 = vadd.f32 %v1043_v44, %v372_v41 }
 0x119   :  { %v274_v43 = vmax.f32 %v241_v42, 0.0 }
 0x11b   :  { %654 = vmatmul.msk.f32.gmra.mxu3 %vm302_vm2, %v274_v43 }
 0x11e   :  { %v375_v46 = vpop.f32.mrf.mxu2 }
 0x11f   :  { %v376_v50 = vadd.f32 %v1043_v44, %v375_v46 }
 0x120   :  { %v437_v47 = vpop.f32.mrf.mxu0 }
 0x121   :  { %v438_v48 = vadd.f32 %v437_v47, %v373_v45 }
 0x123   :  { %v485_v49 = vmax.f32 %v438_v48, 0.0 }
 0x125   :  { %537 = vmatmul.f32.vlgmr.msrb.gmra.mxu3 %v485_v49 }
 0x126   :  { %v378_v51 = vpop.f32.mrf.mxu2 }
 0x127   :  { %v379_v54 = vadd.f32 %v1043_v44, %v378_v51 }
 0x128   :  { %v440_v52 = vpop.f32.mrf.mxu0 }
 0x129   :  { %v441_v1 = vadd.f32 %v440_v52, %v376_v50 }
 0x12b   :  { %v486_v53 = vmax.f32 %v441_v1, 0.0 }
 0x12d   :  { %540 = vmatmul.f32.gmra.mxu3 %v486_v53 }
 0x12e   :  { %v381_v55 = vpop.f32.mrf.mxu2 }
 0x12f   :  { %v382_v58 = vadd.f32 %v1043_v44, %v381_v55 }
 0x130   :  { %v443_v57 = vpop.f32.mrf.mxu0 }
 0x131   :  { %v444_v59 = vadd.f32 %v443_v57, %v379_v54 }
 0x133   :  { %v487_v60 = vmax.f32 %v444_v59, 0.0 }
 0x135   :  { %543 = vmatmul.f32.gmra.mxu3 %v487_v60 }
 0x136   :  { %v384_v61 = vpop.f32.mrf.mxu2 }
 0x137   :  { %v385_v62 = vadd.f32 %v1043_v44, %v384_v61  ;;  %v686_v61 = vld [vmem:[%s1135_s6] ss:$0 sm:$0xff] }
 0x138   :  { %v446_v63 = vpop.f32.mrf.mxu0 }
 0x139   :  { %v447_v0 = vadd.f32 %v446_v63, %v382_v58 }
 0x13b   :  { %v488_v2 = vmax.f32 %v447_v0, 0.0 }
 0x13d   :  { %546 = vmatmul.f32.gmra.mxu3 %v488_v2 }
 0x13e   :  { %v387_v3 = vpop.f32.mrf.mxu2 }
 0x13f   :  { %v388_v7 = vadd.f32 %v1043_v44, %v387_v3 }
 0x140   :  { %v449_v4 = vpop.f32.mrf.mxu0 }
 0x141   :  { %v450_v5 = vadd.f32 %v449_v4, %v385_v62 }
 0x143   :  { %v489_v6 = vmax.f32 %v450_v5, 0.0 }
 0x145   :  { %549 = vmatmul.f32.gmra.mxu3 %v489_v6 }
 0x146   :  { %v390_v8 = vpop.f32.mrf.mxu2 }
 0x147   :  { %v391_v12 = vadd.f32 %v1043_v44, %v390_v8 }
 0x148   :  { %v452_v9 = vpop.f32.mrf.mxu0 }
 0x149   :  { %v453_v10 = vadd.f32 %v452_v9, %v388_v7 }
 0x14b   :  { %v490_v11 = vmax.f32 %v453_v10, 0.0 }
 0x14d   :  { %552 = vmatmul.f32.gmra.mxu3 %v490_v11 }
 0x14e   :  { %v393_v13 = vpop.f32.mrf.mxu2 }
 0x14f   :  { %v394_v17 = vadd.f32 %v1043_v44, %v393_v13 }
 0x150   :  { %v455_v14 = vpop.f32.mrf.mxu0 }
 0x151   :  { %v456_v15 = vadd.f32 %v455_v14, %v391_v12 }
 0x153   :  { %v491_v16 = vmax.f32 %v456_v15, 0.0 }
 0x155   :  { %555 = vmatmul.f32.gmra.mxu3 %v491_v16 }
 0x156   :  { %v396_v18 = vpop.f32.mrf.mxu2 }
 0x157   :  { %v397_v22 = vadd.f32 %v1043_v44, %v396_v18 }
 0x158   :  { %v458_v19 = vpop.f32.mrf.mxu0 }
 0x159   :  { %v459_v20 = vadd.f32 %v458_v19, %v394_v17 }
 0x15b   :  { %v492_v21 = vmax.f32 %v459_v20, 0.0 }
 0x15d   :  { %558 = vmatmul.f32.gmra.mxu3 %v492_v21 }
 0x15e   :  { %v399_v23 = vpop.f32.mrf.mxu2 }
 0x15f   :  { %v400_v27 = vadd.f32 %v1043_v44, %v399_v23 }
 0x160   :  { %v461_v24 = vpop.f32.mrf.mxu0 }
 0x161   :  { %v462_v25 = vadd.f32 %v461_v24, %v397_v22 }
 0x163   :  { %v493_v26 = vmax.f32 %v462_v25, 0.0 }
 0x165   :  { %561 = vmatmul.f32.gmra.mxu3 %v493_v26 }
 0x166   :  { %v402_v28 = vpop.f32.mrf.mxu2 }
 0x167   :  { %v403_v32 = vadd.f32 %v1043_v44, %v402_v28 }
 0x168   :  { %v464_v29 = vpop.f32.mrf.mxu0 }
 0x169   :  { %v465_v30 = vadd.f32 %v464_v29, %v400_v27 }
 0x16b   :  { %v494_v31 = vmax.f32 %v465_v30, 0.0 }
 0x16d   :  { %564 = vmatmul.f32.gmra.mxu3 %v494_v31 }
 0x16e   :  { %v405_v35 = vpop.f32.mrf.mxu2 }
 0x16f   :  { %v406_v37 = vadd.f32 %v1043_v44, %v405_v35 }
 0x170   :  { %v467_v33 = vpop.f32.mrf.mxu1 }
 0x171   :  { %v468_v34 = vadd.f32 %v467_v33, %v403_v32 }
 0x173   :  { %v495_v36 = vmax.f32 %v468_v34, 0.0 }
 0x175   :  { %567 = vmatmul.f32.gmra.mxu3 %v495_v36 }
 0x176   :  { %v408_v40 = vpop.f32.mrf.mxu2 }
 0x177   :  { %v409_v41 = vadd.f32 %v1043_v44, %v408_v40 }
 0x178   :  { %v470_v38 = vpop.f32.mrf.mxu1 }
 0x179   :  { %v471_v39 = vadd.f32 %v470_v38, %v406_v37 }
 0x17b   :  { %v496_v56 = vmax.f32 %v471_v39, 0.0 }
 0x17d   :  { %570 = vmatmul.f32.gmra.mxu3 %v496_v56 }
 0x17e   :  { %v411_v42 = vpop.f32.mrf.mxu2 }
 0x17f   :  { %v412_v47 = vadd.f32 %v1043_v44, %v411_v42 }
 0x186   :  { %v473_v43 = vpop.f32.mrf.mxu3  ;;  %v414_v49 = vpop.f32.mrf.mxu2 }
 0x187   :  { %v474_v45 = vadd.f32 %v473_v43, %v409_v41  ;;  %v415_v52 = vadd.f32 %v1043_v44, %v414_v49 }
 0x189   :  { %v497_v46 = vmax.f32 %v474_v45, 0.0 }
 0x18b   :  { %573 = vmatmul.f32.gmra.mxu3 %v497_v46 }
 0x18e   :  { %v476_v48 = vpop.f32.mrf.mxu3  ;;  %v417_v54 = vpop.f32.mrf.mxu2 }
 0x18f   :  { %v477_v50 = vadd.f32 %v476_v48, %v412_v47  ;;  %v418_v57 = vadd.f32 %v1043_v44, %v417_v54 }
 0x191   :  { %v498_v51 = vmax.f32 %v477_v50, 0.0 }
 0x193   :  { %576 = vmatmul.f32.gmra.mxu3 %v498_v51 }
 0x196   :  { %v479_v1 = vpop.f32.mrf.mxu3 }
 0x197   :  { %v480_v53 = vadd.f32 %v479_v1, %v415_v52 }
 0x199   :  { %v499_v55 = vmax.f32 %v480_v53, 0.0 }
 0x19b   :  { %579 = vmatmul.f32.gmra.mxu3 %v499_v55 }
 0x19e   :  { %v482_v59 = vpop.f32.mrf.mxu3 }
 0x19f   :  { %v483_v60 = vadd.f32 %v482_v59, %v418_v57 }
 0x1a1   :  { %v500_v58 = vmax.f32 %v483_v60, 0.0 }
 0x1a3   :  { %582 = vmatmul.f32.gmra.mxu3 %v500_v58 }
 0x1a8   :  { %v538_v63 = vpop.f32.mrf.mxu3 }
 0x1a9   :  { %v539_v0 = vadd.f32 %v686_v61, %v538_v63 }
 0x1ab   :  { %586 = vst.msk [vmem:[%s1136_s7] sm:$0xff] %vm64_vm0, %v539_v0 }
 0x1b0   :  { %v541_v2 = vpop.f32.mrf.mxu3 }
 0x1b1   :  { %v542_v62 = vadd.f32 %v686_v61, %v541_v2 }
 0x1b3   :  { %587 = vst.msk [vmem:[%s1136_s7 + $0x8] sm:$0xff] %vm64_vm0, %v542_v62 }
 0x1b8   :  { %v544_v44 = vpop.f32.mrf.mxu3 }
 0x1b9   :  { %v545_v3 = vadd.f32 %v686_v61, %v544_v44 }
 0x1bb   :  { %588 = vst.msk [vmem:[%s1136_s7 + $0x10] sm:$0xff] %vm64_vm0, %v545_v3 }
 0x1c0   :  { %v547_v4 = vpop.f32.mrf.mxu3 }
 0x1c1   :  { %v548_v5 = vadd.f32 %v686_v61, %v547_v4 }
 0x1c3   :  { %589 = vst.msk [vmem:[%s1136_s7 + $0x18] sm:$0xff] %vm64_vm0, %v548_v5 }
 0x1c8   :  { %v550_v6 = vpop.f32.mrf.mxu3 }
 0x1c9   :  { %v551_v7 = vadd.f32 %v686_v61, %v550_v6 }
 0x1cb   :  { %590 = vst.msk [vmem:[%s1136_s7 + $0x20] sm:$0xff] %vm64_vm0, %v551_v7 }
 0x1d0   :  { %v553_v8 = vpop.f32.mrf.mxu3 }
 0x1d1   :  { %v554_v9 = vadd.f32 %v686_v61, %v553_v8 }
 0x1d3   :  { %591 = vst.msk [vmem:[%s1136_s7 + $0x28] sm:$0xff] %vm64_vm0, %v554_v9 }
 0x1d8   :  { %v556_v10 = vpop.f32.mrf.mxu3 }
 0x1d9   :  { %v557_v11 = vadd.f32 %v686_v61, %v556_v10 }
 0x1db   :  { %592 = vst.msk [vmem:[%s1136_s7 + $0x30] sm:$0xff] %vm64_vm0, %v557_v11 }
 0x1e0   :  { %v559_v12 = vpop.f32.mrf.mxu3 }
 0x1e1   :  { %v560_v13 = vadd.f32 %v686_v61, %v559_v12 }
 0x1e3   :  { %593 = vst.msk [vmem:[%s1136_s7 + $0x38] sm:$0xff] %vm64_vm0, %v560_v13 }
 0x1e8   :  { %v562_v14 = vpop.f32.mrf.mxu3 }
 0x1e9   :  { %v563_v15 = vadd.f32 %v686_v61, %v562_v14 }
 0x1eb   :  { %594 = vst.msk [vmem:[%s1136_s7 + $0x40] sm:$0xff] %vm64_vm0, %v563_v15 }
 0x1f0   :  { %v565_v16 = vpop.f32.mrf.mxu3 }
 0x1f1   :  { %v566_v17 = vadd.f32 %v686_v61, %v565_v16 }
 0x1f3   :  { %595 = vst.msk [vmem:[%s1136_s7 + $0x48] sm:$0xff] %vm64_vm0, %v566_v17 }
 0x1f8   :  { %v568_v18 = vpop.f32.mrf.mxu3 }
 0x1f9   :  { %v569_v19 = vadd.f32 %v686_v61, %v568_v18 }
 0x1fb   :  { %596 = vst.msk [vmem:[%s1136_s7 + $0x50] sm:$0xff] %vm64_vm0, %v569_v19 }
 0x200   :  { %v571_v20 = vpop.f32.mrf.mxu3 }
 0x201   :  { %v572_v21 = vadd.f32 %v686_v61, %v571_v20 }
 0x203   :  { %597 = vst.msk [vmem:[%s1136_s7 + $0x58] sm:$0xff] %vm64_vm0, %v572_v21 }
 0x20e   :  { %v574_v22 = vpop.f32.mrf.mxu3 }
 0x20f   :  { %v575_v23 = vadd.f32 %v686_v61, %v574_v22 }
 0x211   :  { %598 = vst.msk [vmem:[%s1136_s7 + $0x60] sm:$0xff] %vm64_vm0, %v575_v23 }
 0x216   :  { %v577_v24 = vpop.f32.mrf.mxu3 }
 0x217   :  { %v578_v25 = vadd.f32 %v686_v61, %v577_v24 }
 0x219   :  { %599 = vst.msk [vmem:[%s1136_s7 + $0x68] sm:$0xff] %vm64_vm0, %v578_v25 }
 0x21e   :  { %v580_v26 = vpop.f32.mrf.mxu3 }
 0x21f   :  { %v581_v27 = vadd.f32 %v686_v61, %v580_v26 }
 0x221   :  { %600 = vst.msk [vmem:[%s1136_s7 + $0x70] sm:$0xff] %vm64_vm0, %v581_v27 }
 0x226   :  { %v583_v28 = vpop.f32.mrf.mxu3 }
 0x227   :  { %v584_v29 = vadd.f32 %v686_v61, %v583_v28 }
 0x229   :  { %601 = vst.msk [vmem:[%s1136_s7 + $0x78] sm:$0xff] %vm64_vm0, %v584_v29 }

</bundles_post_ra>
